<compile_context>
chip_gen: v5e
topology: v5e:2x2
jax: 0.10.0
libtpu: 0.0.40
codegen_flags: <defaults>
</compile_context>

<pallas_src>
import functools

import jax
import jax.numpy as jnp
from jax.experimental import pallas as pl
from jax.experimental.pallas import tpu as pltpu


_VMEM_LIMIT = 32 * 1024 * 1024


# ----------------------------------------------------------------------------
# tile selection
# ----------------------------------------------------------------------------
def _pick_tm(m, bytes_per_col, budget=16 << 20, cap=16384):
    """Lane tile: full M if it fits, else the largest 128-multiple divisor
    under the budget/cap; if none divides, return a 128-multiple tile and let
    the caller pad M (never a giant unpipelined single block)."""
    tmax = min(cap, max(128, budget // max(int(bytes_per_col), 1)))
    if m <= tmax:
        return m
    t = max(128, (tmax // 128) * 128)
    tt = t
    while tt >= 128:
        if m % tt == 0:
            return tt
        tt -= 128
    return t                      # caller pads M up to a multiple of t


# ----------------------------------------------------------------------------
# Pallas kernels
# ----------------------------------------------------------------------------
def _conv_act_kernel(w_ref, a_ref, o_ref, *, act):
    """o[g, C_out, tm] = act(W[g] @ A[g, :, tm]) — lane-dense output."""
    y = jnp.dot(w_ref[0], a_ref[0], preferred_element_type=jnp.float32)
    if act == "relu":
        y = jnp.maximum(y, 0.0)
    elif act == "tanh":
        y = jnp.tanh(y)
    o_ref[0] = y.astype(o_ref.dtype)


def _conv_bn_relu_kernel(w_ref, a_ref, g_ref, b_ref, o_ref, y_ref, *, eps):
    """Fused conv-matmul + BatchNorm (training-mode batch stats) + ReLU.

    w_ref: [G, C_out, K] bf16, a_ref: [G, K, M] bf16, g_ref/b_ref: [C_out, 1]
    f32, o_ref: [G, C_out, M] bf16, y_ref: [G, C_out, M] f32 VMEM scratch.
    Stats are per channel over (G, M) == (N, H, W), two-pass mean/variance.
    """
    gdim = w_ref.shape[0]
    for g in range(gdim):                      # static unroll over phases
        y_ref[g] = jnp.dot(w_ref[g], a_ref[g],
                           preferred_element_type=jnp.float32)
    yf = y_ref[...]
    cnt = yf.shape[0] * yf.shape[2]
    s = jnp.sum(yf, axis=2, keepdims=True)                 # lane reduce
    mean = jnp.sum(s, axis=0, keepdims=True) / cnt         # [1, C, 1]
    d = yf - mean
    v = jnp.sum(d * d, axis=2, keepdims=True)
    var = jnp.sum(v, axis=0, keepdims=True) / cnt          # [1, C, 1]
    scale = g_ref[...][None, :, :] * jax.lax.rsqrt(var + eps)
    bias = b_ref[...][None, :, :] - mean * scale
    o_ref[...] = jnp.maximum(yf * scale + bias, 0.0).astype(o_ref.dtype)


# ----------------------------------------------------------------------------
# Pallas wrappers
# ----------------------------------------------------------------------------
def pallas_conv_act(wm, a, act="none", out_dtype=jnp.bfloat16):
    """wm: [G, C_out, K], a: [G, K, M] -> [G, C_out, M]; activation fused."""
    gdim, cout, k = wm.shape
    m = a.shape[2]
    bpc = 2 * (k * 2 + cout * jnp.dtype(out_dtype).itemsize)
    tm = _pick_tm(m, bpc)
    m_pad = ((m + tm - 1) // tm) * tm
    if m_pad != m:
        a = jnp.pad(a, ((0, 0), (0, 0), (0, m_pad - m)))
    out = pl.pallas_call(
        functools.partial(_conv_act_kernel, act=act),
        out_shape=jax.ShapeDtypeStruct((gdim, cout, m_pad), out_dtype),
        grid=(gdim, m_pad // tm),
        in_specs=[pl.BlockSpec((1, cout, k), lambda g, i: (g, 0, 0)),
                  pl.BlockSpec((1, k, tm), lambda g, i: (g, 0, i))],
        out_specs=pl.BlockSpec((1, cout, tm), lambda g, i: (g, 0, i)),
        compiler_params=pltpu.CompilerParams(
            dimension_semantics=("parallel", "parallel"),
            vmem_limit_bytes=_VMEM_LIMIT),
    )(wm, a)
    return out[:, :, :m] if m_pad != m else out


def pallas_conv_bn_relu(wm, a, gamma, beta, eps=1e-5, out_dtype=jnp.bfloat16):
    """Fused conv matmul + BN(batch stats) + ReLU, single HBM writeback.

    All BN layers of this net have A <= ~1 MiB, so the whole layer runs as a
    single block with a VMEM-resident f32 intermediate.
    """
    gdim, cout, k = wm.shape
    m = a.shape[2]
    return pl.pallas_call(
        functools.partial(_conv_bn_relu_kernel, eps=eps),
        out_shape=jax.ShapeDtypeStruct((gdim, cout, m), out_dtype),
        grid=(1,),
        in_specs=[pl.BlockSpec((gdim, cout, k), lambda i: (0, 0, 0)),
                  pl.BlockSpec((gdim, k, m), lambda i: (0, 0, 0)),
                  pl.BlockSpec((cout, 1), lambda i: (0, 0)),
                  pl.BlockSpec((cout, 1), lambda i: (0, 0))],
        out_specs=pl.BlockSpec((gdim, cout, m), lambda i: (0, 0, 0)),
        scratch_shapes=[pltpu.VMEM((gdim, cout, m), jnp.float32)],
        compiler_params=pltpu.CompilerParams(
            dimension_semantics=("arbitrary",),
            vmem_limit_bytes=_VMEM_LIMIT),
    )(wm, a,
      gamma.reshape(cout, 1).astype(jnp.float32),
      beta.reshape(cout, 1).astype(jnp.float32))


# ----------------------------------------------------------------------------
# conv / conv-transpose glue (channel-major)
# ----------------------------------------------------------------------------
def conv_patches(x, ksize, stride, pad):
    """x: [C, B, H, W] -> A: [C*k*k, B*Ho*Wo] (rows ordered c, kh, kw)."""
    c, b, h, w = x.shape
    xp = jnp.pad(x, ((0, 0), (0, 0), (pad, pad), (pad, pad)))
    ho = (h + 2 * pad - ksize) // stride + 1
    wo = (w + 2 * pad - ksize) // stride + 1
    cols = [xp[:, :, kh:kh + stride * ho:stride, kw:kw + stride * wo:stride]
            for kh in range(ksize) for kw in range(ksize)]
    a = jnp.stack(cols, axis=1).reshape(c * ksize * ksize, b * ho * wo)
    return a, (b, ho, wo)


def convT_patches(x, ksize, stride, pad):
    """Transposed conv (used only for stride-1 layers) as pad + stride-1 conv
    patches (channel-major)."""
    c, b, h, w = x.shape
    hd = (h - 1) * stride + 1
    wd = (w - 1) * stride + 1
    pe = ksize - 1 - pad
    xp = jnp.zeros((c, b, hd + 2 * pe, wd + 2 * pe), x.dtype)
    xp = xp.at[:, :, pe:pe + hd:stride, pe:pe + wd:stride].set(x)
    ho = hd + 2 * pe - ksize + 1
    wo = wd + 2 * pe - ksize + 1
    cols = [xp[:, :, kh:kh + ho, kw:kw + wo]
            for kh in range(ksize) for kw in range(ksize)]
    a = jnp.stack(cols, axis=1).reshape(c * ksize * ksize, b * ho * wo)
    return a, (b, ho, wo)


def conv_weight_matrix(w):
    """PyTorch Conv2d weight [C_out, C_in, k, k] -> [C_out, C_in*k*k] bf16."""
    return w.reshape(w.shape[0], -1).astype(jnp.bfloat16)


def convT_weight_matrix(w):
    """PyTorch ConvTranspose2d weight [C_in, C_out, k, k] -> equivalent conv
    weight matrix [C_out, C_in*k*k] bf16 (spatial flip + in/out swap)."""
    w_eq = jnp.flip(w, axis=(2, 3)).transpose(1, 0, 2, 3)
    return w_eq.reshape(w_eq.shape[0], -1).astype(jnp.bfloat16)


def deconv_phase_inputs(x, w):
    """Sub-pixel decomposition of ConvTranspose2d(k=4, s=2, p=1).

    x: [C_in, B, H, W] bf16 (channel-major), w: [C_in, C_out, 4, 4] f32.
    Returns A: [4, C_in*4, B*H*W] bf16 and Wm: [4, C_out, C_in*4] bf16, where
    phase g = 2*py + px produces output positions (2m+py, 2n+px).
    """
    c, b, h, wd = x.shape
    cout = w.shape[1]
    a_list, w_list = [], []
    for py in (0, 1):
        for px in (0, 1):
            pad_h = (1, 0) if py == 0 else (0, 1)
            pad_w = (1, 0) if px == 0 else (0, 1)
            xp = jnp.pad(x, ((0, 0), (0, 0), pad_h, pad_w))
            taps = [xp[:, :, a:a + h, bb:bb + wd]
                    for a in range(2) for bb in range(2)]
            a_list.append(jnp.stack(taps, axis=1).reshape(c * 4, b * h * wd))
            # kernel rows/cols: even output -> taps (3,1); odd output -> (2,0)
            wsub = w[:, :, (3 - py)::-2, :][:, :, :, (3 - px)::-2]
            w_list.append(
                jnp.transpose(wsub, (1, 0, 2, 3)).reshape(cout, c * 4))
    return (jnp.stack(a_list, 0).astype(jnp.bfloat16),
            jnp.stack(w_list, 0).astype(jnp.bfloat16))


def interleave_phases(y, cout, b, h, wd):
    """y: [4, C_out, B*H*W] (phase g = 2*py + px) -> [C_out, B, 2H, 2W]."""
    y = y.reshape(2, 2, cout, b, h, wd)
    y = jnp.transpose(y, (2, 3, 4, 0, 5, 1))
    return y.reshape(cout, b, 2 * h, 2 * wd)


# ----------------------------------------------------------------------------
# Generater forward
# ----------------------------------------------------------------------------
def generater_forward(x, params):
    # NCHW -> channel-major [C, B, H, W]; bf16 activations between layers.
    h = jnp.transpose(x, (1, 0, 2, 3)).astype(jnp.bfloat16)

    # encoder: Conv2d (+BN) + ReLU
    for w, bn, stride, pad in params["enc"]:
        cout = w.shape[0]
        a, (b, ho, wo) = conv_patches(h, w.shape[-1], stride, pad)
        wm = conv_weight_matrix(w)
        if bn is None:
            y = pallas_conv_act(wm[None], a[None], act="relu")
        else:
            y = pallas_conv_bn_relu(wm[None], a[None], bn[0], bn[1])
        h = y[0].reshape(cout, b, ho, wo)

    # decoder: ConvTranspose2d (+BN+ReLU), last layer Tanh
    n_dec = len(params["dec"])
    for li, (w, bn, stride, pad) in enumerate(params["dec"]):
        cout = w.shape[1]
        last = li == n_dec - 1
        if stride == 1:
            a, (b, ho, wo) = convT_patches(h, w.shape[-1], stride, pad)
            wm = convT_weight_matrix(w)
            if bn is None:
                act = "tanh" if last else "relu"
                odt = jnp.float32 if last else jnp.bfloat16
                y = pallas_conv_act(wm[None], a[None], act=act, out_dtype=odt)
            else:
                y = pallas_conv_bn_relu(wm[None], a[None], bn[0], bn[1])
            h = y[0].reshape(cout, b, ho, wo)
        else:
            _, b, hi, wi = h.shape
            a4, wm4 = deconv_phase_inputs(h, w)
            if bn is None:
                act = "tanh" if last else "relu"
                odt = jnp.float32 if last else jnp.bfloat16
                y = pallas_conv_act(wm4, a4, act=act, out_dtype=odt)
            else:
                y = pallas_conv_bn_relu(wm4, a4, bn[0], bn[1])
            h = interleave_phases(y, cout, b, hi, wi)

    # channel-major -> NCHW
    return jnp.transpose(h, (1, 0, 2, 3)).astype(jnp.float32)


def init_params(key, nc, ngf, nbottleneck):
    # (C_in, C_out, stride, pad, has_bn) following the nn.Sequential exactly.
    enc_cfg = [
        (nc,       ngf,      2, 1, False),
        (ngf,      ngf,      2, 1, True),
        (ngf,      ngf * 2,  2, 1, True),
        (ngf * 2,  ngf * 4,  2, 1, True),
        (ngf * 4,  ngf * 8,  2, 1, True),
        (ngf * 8,  ngf * 16, 2, 1, True),
        (ngf * 16, nbottleneck, 1, 0, True),
    ]
    dec_cfg = [
        (nbottleneck, ngf * 16, 1, 0, True),
        (ngf * 16, ngf * 8, 2, 1, True),
        (ngf * 8,  ngf * 4, 2, 1, True),
        (ngf * 4,  ngf * 2, 2, 1, True),
        (ngf * 2,  ngf,     2, 1, True),
        (ngf,      ngf,     2, 1, True),
        (ngf,      nc,      2, 1, False),
    ]
    enc, dec = [], []
    for cin, cout, s, p, bn in enc_cfg:
        key, k1 = jax.random.split(key)
        w = jax.random.normal(k1, (cout, cin, 4, 4), jnp.float32) * 0.05
        bn_p = (jnp.ones((cout,), jnp.float32),
                jnp.zeros((cout,), jnp.float32)) if bn else None
        enc.append((w, bn_p, s, p))
    for cin, cout, s, p, bn in dec_cfg:
        key, k1 = jax.random.split(key)
        # PyTorch ConvTranspose2d weight layout: [C_in, C_out, kH, kW]
        w = jax.random.normal(k1, (cin, cout, 4, 4), jnp.float32) * 0.05
        bn_p = (jnp.ones((cout,), jnp.float32),
                jnp.zeros((cout,), jnp.float32)) if bn else None
        dec.append((w, bn_p, s, p))
    return {"enc": enc, "dec": dec}


# ----------------------------------------------------------------------------
# main
# ----------------------------------------------------------------------------
if __name__ == "__main__":
    key = jax.random.PRNGKey(0)

    # sanity 1: lane-dense Pallas conv path vs XLA reference (tiny problem).
    kx, kw_ = jax.random.split(key)
    xt = jax.random.normal(kx, (1, 3, 8, 8), jnp.float32)
    wt = jax.random.normal(kw_, (5, 3, 4, 4), jnp.float32) * 0.1
    xt_c = jnp.transpose(xt, (1, 0, 2, 3)).astype(jnp.bfloat16)
    a, (b_, ho_, wo_) = conv_patches(xt_c, 4, 2, 1)
    y2d = pallas_conv_act(conv_weight_matrix(wt)[None], a[None],
                          act="none", out_dtype=jnp.float32)
    y_mine = jnp.transpose(y2d[0].reshape(5, b_, ho_, wo_), (1, 0, 2, 3))
    y_ref = jax.lax.conv_general_dilated(
        xt.astype(jnp.bfloat16).astype(jnp.float32),
        wt.astype(jnp.bfloat16).astype(jnp.float32),
        window_strides=(2, 2), padding=((1, 1), (1, 1)),
        dimension_numbers=("NCHW", "OIHW", "NCHW"))
    assert float(jnp.max(jnp.abs(y_mine - y_ref))) < 2e-2, "conv path mismatch"

    # sanity 2: sub-pixel phase-decomposed deconv path vs XLA reference.
    kx2, kw2 = jax.random.split(kw_)
    xt2 = jax.random.normal(kx2, (2, 4, 8, 8), jnp.float32)
    wt2 = jax.random.normal(kw2, (4, 5, 4, 4), jnp.float32) * 0.1
    xt2_c = jnp.transpose(xt2, (1, 0, 2, 3)).astype(jnp.bfloat16)
    a4, wm4 = deconv_phase_inputs(xt2_c, wt2)
    y4 = pallas_conv_act(wm4, a4, act="none", out_dtype=jnp.float32)
    y_mine2 = jnp.transpose(interleave_phases(y4, 5, 2, 8, 8), (1, 0, 2, 3))
    w_eq = jnp.transpose(jnp.flip(wt2, (2, 3)), (1, 0, 2, 3))
    y_ref2 = jax.lax.conv_general_dilated(
        xt2.astype(jnp.bfloat16).astype(jnp.float32),
        w_eq.astype(jnp.bfloat16).astype(jnp.float32),
        window_strides=(1, 1), padding=((2, 2), (2, 2)),
        lhs_dilation=(2, 2),
        dimension_numbers=("NCHW", "OIHW", "NCHW"))
    assert float(jnp.max(jnp.abs(y_mine2 - y_ref2))) < 2e-2, "deconv mismatch"

    # Generater: 6 stride-2 convs + a 4x4 valid conv force input spatial = 256.
    # Small hyper-params: nc=1, ngf=4, nBottleneck=8, batch=2.
    nc, ngf, nbottleneck = 1, 4, 8
    params = init_params(jax.random.PRNGKey(1), nc, ngf, nbottleneck)

    x = jax.random.normal(jax.random.PRNGKey(0), (2, nc, 256, 256), jnp.float32)
    fwd = jax.jit(lambda inp: generater_forward(inp, params))
    out = jax.block_until_ready(fwd(x))

    assert out.shape == (2, nc, 256, 256), out.shape
    assert bool(jnp.all(jnp.isfinite(out)))
    assert bool(jnp.all(jnp.abs(out) <= 1.0 + 1e-6))   # tanh output range

    print("KERNEL_OK")
</pallas_src>

<mosaic_0001>
module attributes {stable_mosaic.version = 11 : i64} {
  func.func @_conv_act_kernel(%arg0: i32, %arg1: i32, %arg2: memref<1x5x48xbf16, #tpu.memory_space<vmem>>, %arg3: memref<1x48x16xbf16, #tpu.memory_space<vmem>>, %arg4: memref<1x5x16xf32, #tpu.memory_space<vmem>>) attributes {dimension_semantics = [#tpu.dimension_semantics<parallel>, #tpu.dimension_semantics<parallel>], iteration_bounds = array<i64: 1, 1>, scalar_prefetch = 0 : i64, scratch_operands = 0 : i64, tpu.core_type = #tpu.core_type<tc>, window_params = [{transform_indices = @transform_0, window_bounds = array<i64: 1, 5, 48>}, {transform_indices = @transform_1, window_bounds = array<i64: 1, 48, 16>}, {transform_indices = @transform_2, window_bounds = array<i64: 1, 5, 16>}]} {
    %c0 = arith.constant 0 : index
    %c0_0 = arith.constant 0 : index
    %c0_1 = arith.constant 0 : index
    %0 = vector.load %arg2[%c0, %c0_0, %c0_1] : memref<1x5x48xbf16, #tpu.memory_space<vmem>>, vector<1x5x48xbf16>
    %1 = vector.shape_cast %0 : vector<1x5x48xbf16> to vector<5x48xbf16>
    %c0_2 = arith.constant 0 : index
    %c0_3 = arith.constant 0 : index
    %c0_4 = arith.constant 0 : index
    %2 = vector.load %arg3[%c0_2, %c0_3, %c0_4] : memref<1x48x16xbf16, #tpu.memory_space<vmem>>, vector<1x48x16xbf16>
    %3 = vector.shape_cast %2 : vector<1x48x16xbf16> to vector<48x16xbf16>
    %cst = arith.constant dense<0.000000e+00> : vector<5x16xf32>
    %4 = tpu.matmul %1, %3, %cst {dimension_numbers = #tpu.dot_dimension_numbers<[1], [0], [0], [1], [0, 0, 1, 1], [], []>} : vector<5x48xbf16>, vector<48x16xbf16>, vector<5x16xf32> -> vector<5x16xf32>
    %c0_5 = arith.constant 0 : index
    %c0_6 = arith.constant 0 : index
    %c0_7 = arith.constant 0 : index
    %5 = vector.load %arg4[%c0_5, %c0_6, %c0_7] : memref<1x5x16xf32, #tpu.memory_space<vmem>>, vector<1x5x16xf32>
    %6 = vector.shape_cast %5 : vector<1x5x16xf32> to vector<5x16xf32>
    %7 = vector.shape_cast %4 : vector<5x16xf32> to vector<1x5x16xf32>
    tpu.vector_store %arg4[%c0_5, %c0_6, %c0_7], %7 {strides = array<i32>} : memref<1x5x16xf32, #tpu.memory_space<vmem>>, vector<1x5x16xf32>,
    return
  }
  func.func @transform_0(%arg0: i32, %arg1: i32) -> (i32, i32, i32) {
    %c0_i32 = arith.constant 0 : i32
    %c0_i32_0 = arith.constant 0 : i32
    %c0_i32_1 = arith.constant 0 : i32
    return %arg0, %c0_i32, %c0_i32_0 : i32, i32, i32
  }
  func.func @transform_1(%arg0: i32, %arg1: i32) -> (i32, i32, i32) {
    %c0_i32 = arith.constant 0 : i32
    %c0_i32_0 = arith.constant 0 : i32
    return %arg0, %c0_i32, %arg1 : i32, i32, i32
  }
  func.func @transform_2(%arg0: i32, %arg1: i32) -> (i32, i32, i32) {
    %c0_i32 = arith.constant 0 : i32
    %c0_i32_0 = arith.constant 0 : i32
    return %arg0, %c0_i32, %arg1 : i32, i32, i32
  }
}

</mosaic_0001>

<bundles_post_ra>
// kernel: tpu_custom_call.1
= control target key start
LH: loop header
LB: loop body
LE: loop exit
PB: predicated region body
PF: predicated region fallthrough
CT: control target
= control target key end

     0   :  { %vm37_vm0 = vcmask 392192   ;;  %vm54_vm1 = vcmask 126976   ;;  %s106_s1 = inlined_call_operand.vmem [shape: bf16[1,48,16], index: 1, kind: input, shape index: {}]   ;;  %s107_s0 = inlined_call_operand.vmem [shape: bf16[1,5,48], index: 0, kind: input, shape index: {}]   ;;  %s108_s2 = inlined_call_operand.vmem [shape: f32[1,5,16], index: 2, kind: output, shape index: {}]  }
   0x1   :  { %v75_v0 = vld [vmem:[%s106_s1 + $0x10] sm:$0xff]  ;;  %v74_v1 = vld [vmem:[%s106_s1 + $0x8] sm:$0xff]  ;;  %v73_v2 = vld [vmem:[%s106_s1] sm:$0xff] }
   0x2   :  { %46 = vmatpush.bf16.msra.mxu0 %v75_v0  ;;  %v12_v3 = vld [vmem:[%s107_s0] sm:$0x7] }
   0x6   :  { %47 = vmatpush.bf16.msra.mxu0 %v74_v1 }
   0xa   :  { %48 = vmatpush.bf16.msra.mxu0 %v73_v2 }
   0xd   :  { %72 = vmatmul.msk.bf16.vlgmr.msra.gmra.mxu0 %vm37_vm0, %v12_v3 }
  0x8a   :  { %v50_v4 = vpop.f32.mrf.mxu0 }
  0x8b   :  { %55 = vst.msk [vmem:[%s108_s2] sm:$0x1f] %vm54_vm1, %v50_v4 }
  0x92   :  { %v52_v5 = vpop.f32.mrf.mxu0 }

</bundles_post_ra>
